<compile_context>
chip_gen: v7x
topology: tpu7x:2x2x1
jax: 0.10.0
libtpu: 0.0.40
codegen_flags: <defaults>
</compile_context>

<pallas_src>
import math
import jax
import jax.numpy as jnp
from jax import lax
from jax.experimental import pallas as pl
from jax.experimental.pallas import tpu as pltpu

_EPS = 1e-12  # F.normalize default eps


def _round_up(v, m):
    return ((v + m - 1) // m) * m


def _device_caps():
    """(tm_cap, tn_cap, tk_cap, vmem_limit_bytes_or_None, num_tensorcores)."""
    kind = ""
    try:
        kind = jax.devices()[0].device_kind.lower()
    except Exception:  # defensive: never fail tile selection on a device query
        pass
    if "v5" in kind:                     # v5e/v5p: 128 MiB VMEM, 4x128^2 MXU
        return 512, 512, 1024, 96 * 1024 * 1024, 1
    if "v6" in kind:                     # v6e: 128 MiB VMEM, 2x256^2 MXU
        return 1024, 1024, 2048, 96 * 1024 * 1024, 1
    if "v7" in kind or "tpu7" in kind:   # v7x: 64 MiB VMEM per TC, 2 TCs/chip
        return 768, 768, 1024, 48 * 1024 * 1024, 2
    # Unknown generation: conservative tiles + default scoped VMEM limit.
    return 256, 256, 512, None, 1


def _pick_tile(dim_hw, cap, gran):
    """Balanced tile: multiple of `gran`, <= cap, near-minimal padding.

    dim_hw is already a multiple of gran.  We take the fewest blocks that the
    cap allows, then size the tile to just cover dim_hw (pad < nblocks*gran).
    """
    cap = max(gran, min(cap, dim_hw))
    nblocks = -(-dim_hw // cap)                      # ceil
    return _round_up(-(-dim_hw // nblocks), gran)    # ceil, gran-aligned


# ---------------- fused kernels (matmul + column-norm post-scale) ----------


def _norm_linear_kresident_kernel(x_ref, w_ref, o_ref):
    """2-D grid variant: whole K is resident; single dot, no scratch."""
    w = w_ref[...]
    wf = w.astype(jnp.float32)
    # 1 / max(||w_col||, eps) == rsqrt(max(sum(w^2), eps^2)); VPU/XLU work,
    # negligible next to the MXU dot.
    inv_norm = lax.rsqrt(
        jnp.maximum(jnp.sum(wf * wf, axis=0, keepdims=True), _EPS * _EPS))
    acc = jnp.dot(x_ref[...], w, preferred_element_type=jnp.float32)
    o_ref[...] = (acc * inv_norm).astype(o_ref.dtype)   # single lane-dense store


def _norm_linear_ktiled_kernel(x_ref, w_ref, o_ref, acc_ref, ssq_ref):
    """3-D grid variant: K innermost reduction with f32 accumulators."""
    k = pl.program_id(2)

    @pl.when(k == 0)
    def _():
        acc_ref[...] = jnp.zeros_like(acc_ref)
        ssq_ref[...] = jnp.zeros_like(ssq_ref)

    w = w_ref[...]
    wf = w.astype(jnp.float32)
    # Fused column sum-of-squares (recomputed per row-tile i: ~1/tm of the MXU
    # work, rides free VPU/XLU slots, keeps i/j fully 'parallel').
    ssq_ref[...] += jnp.sum(wf * wf, axis=0, keepdims=True)
    acc_ref[...] += jnp.dot(x_ref[...], w, preferred_element_type=jnp.float32)

    @pl.when(k == pl.num_programs(2) - 1)
    def _():
        inv_norm = lax.rsqrt(jnp.maximum(ssq_ref[...], _EPS * _EPS))
        o_ref[...] = (acc_ref[...] * inv_norm).astype(o_ref.dtype)


# --------------------------------- wrapper ---------------------------------


def norm_linear(x2d, weight, *, use_bf16=False, tile_m=None, tile_n=None,
                tile_k=None, force_k_grid=False):
    """x2d: (M, K), weight: (K, N) -> (M, N) == x2d @ (weight / max(||w_col||, eps))."""
    M, K = x2d.shape
    Kw, N = weight.shape
    assert K == Kw, "inner dims must match"

    tm_cap, tn_cap, tk_cap, vmem_limit, n_tc = _device_caps()
    if tile_m is not None:
        tm_cap = _round_up(tile_m, 8)
    if tile_n is not None:
        tn_cap = _round_up(tile_n, 128)
    if tile_k is not None:
        tk_cap = _round_up(tile_k, 128)

    # Pad only to hardware granularity; tiles then (nearly) divide the dims.
    Mh, Nh, Kh = _round_up(M, 8), _round_up(N, 128), _round_up(K, 128)
    tm = _pick_tile(Mh, tm_cap, 8)
    tn = _pick_tile(Nh, tn_cap, 128)

    # v7x has 2 TensorCores: make sure the parallel (i, j) grid has >= 2 blocks
    # so both cores get work (halving tm never costs extra HBM traffic).
    if n_tc > 1 and tm >= 16 and \
            (_round_up(Mh, tm) // tm) * (_round_up(Nh, tn) // tn) < n_tc:
        tm = _round_up(tm // 2, 8)

    Mp, Np = _round_up(Mh, tm), _round_up(Nh, tn)

    compute_dtype = jnp.bfloat16 if use_bf16 else x2d.dtype
    in_bytes = jnp.dtype(compute_dtype).itemsize
    out_bytes = jnp.dtype(x2d.dtype).itemsize

    budget = int(0.85 * (vmem_limit if vmem_limit is not None
                         else 16 * 1024 * 1024))

    # VMEM for the K-resident (2-D grid) variant: double-buffered x / w / out
    # blocks + f32 acc value + f32 temporaries for the in-kernel column sum-sq.
    vmem_2d = (2 * tm * Kh * in_bytes + 2 * Kh * tn * in_bytes
               + 2 * tm * tn * out_bytes + tm * tn * 4 + 2 * Kh * tn * 4)
    use_2d = (not force_k_grid) and (vmem_2d <= budget)

    tk = Kh if use_2d else _pick_tile(Kh, tk_cap, 128)
    Kp = Kh if use_2d else _round_up(Kh, tk)

    # Zero-padding keeps the math exact (zero rows/cols contribute nothing to
    # either the dot or the column norms); padded output is sliced off below.
    xp = x2d if (Mp == M and Kp == K) else jnp.pad(x2d, ((0, Mp - M), (0, Kp - K)))
    wp = weight if (Kp == K and Np == N) else jnp.pad(weight, ((0, Kp - K), (0, Np - N)))
    if use_bf16:
        xp = xp.astype(jnp.bfloat16)
        wp = wp.astype(jnp.bfloat16)

    cparams = pltpu.CompilerParams(
        dimension_semantics=(("parallel", "parallel") if use_2d
                             else ("parallel", "parallel", "arbitrary")),
        vmem_limit_bytes=vmem_limit,
    )

    if use_2d:
        out = pl.pallas_call(
            _norm_linear_kresident_kernel,
            out_shape=jax.ShapeDtypeStruct((Mp, Np), x2d.dtype),
            grid_spec=pltpu.PrefetchScalarGridSpec(
                num_scalar_prefetch=0,
                grid=(Mp // tm, Np // tn),     # j innermost -> x slab stays resident
                in_specs=[
                    pl.BlockSpec((tm, Kp), lambda i, j: (i, 0)),   # x row-slab
                    pl.BlockSpec((Kp, tn), lambda i, j: (0, j)),   # raw weight cols
                ],
                out_specs=pl.BlockSpec((tm, tn), lambda i, j: (i, j)),
            ),
            compiler_params=cparams,
        )(xp, wp)
    else:
        out = pl.pallas_call(
            _norm_linear_ktiled_kernel,
            out_shape=jax.ShapeDtypeStruct((Mp, Np), x2d.dtype),
            grid_spec=pltpu.PrefetchScalarGridSpec(
                num_scalar_prefetch=0,
                grid=(Mp // tm, Np // tn, Kp // tk),   # K innermost (reduction)
                in_specs=[
                    pl.BlockSpec((tm, tk), lambda i, j, k: (i, k)),
                    pl.BlockSpec((tk, tn), lambda i, j, k: (k, j)),
                ],
                out_specs=pl.BlockSpec((tm, tn), lambda i, j, k: (i, j)),
                scratch_shapes=[pltpu.VMEM((tm, tn), jnp.float32),
                                pltpu.VMEM((1, tn), jnp.float32)],
            ),
            compiler_params=cparams,
        )(xp, wp)

    return out if (Mp == M and Np == N) else out[:M, :N]


def make_weight(key, in_dim, out_dim, dtype=jnp.float32):
    # nn.init.xavier_uniform_(w, gain=calculate_gain('relu')):
    # gain = sqrt(2), bound = gain * sqrt(6 / (fan_in + fan_out))
    gain = math.sqrt(2.0)
    bound = gain * math.sqrt(6.0 / (in_dim + out_dim))
    return jax.random.uniform(key, (in_dim, out_dim), dtype=dtype,
                              minval=-bound, maxval=bound)


def _reference(x, w):
    w_n = w / jnp.maximum(jnp.linalg.norm(w, axis=0, keepdims=True), _EPS)
    return x @ w_n


if __name__ == "__main__":
    key = jax.random.PRNGKey(0)
    kx, kw, kx2, kw2 = jax.random.split(key, 4)

    # ---- Module-sized example: batch=2, seq=8, in_dim=32, out_dim=64 ----
    batch, seq, in_dim, out_dim = 2, 8, 32, 64
    x = jax.random.normal(kx, (batch, seq, in_dim), dtype=jnp.float32)
    weight = make_weight(kw, in_dim, out_dim)

    x2d = x.reshape(batch * seq, in_dim)           # flatten leading dims (glue)
    out = norm_linear(x2d, weight).reshape(batch, seq, out_dim)
    jax.block_until_ready(out)

    ref = _reference(x, weight)
    assert out.shape == (batch, seq, out_dim)
    assert jnp.allclose(out, ref, atol=1e-4, rtol=1e-4), "K-resident path mismatch"

    # ---- Exercise the K-tiled (3-D grid) path and its fused-norm accumulator ----
    x2 = jax.random.normal(kx2, (seq, 256), dtype=jnp.float32)
    w2 = make_weight(kw2, 256, 128)
    o2 = norm_linear(x2, w2, tile_k=128, force_k_grid=True)
    jax.block_until_ready(o2)
    assert jnp.allclose(o2, _reference(x2, w2), atol=1e-3, rtol=1e-3), \
        "K-tiled path mismatch"

    # ---- bf16 MXU feed (f32 accumulation); looser tolerance vs f32 reference ----
    o3 = norm_linear(x2d, weight, use_bf16=True).reshape(batch, seq, out_dim)
    jax.block_until_ready(o3)
    assert jnp.allclose(o3, ref, atol=5e-2, rtol=5e-2), "bf16 path mismatch"

    print("KERNEL_OK")
</pallas_src>

<mosaic_0001>
module attributes {stable_mosaic.version = 11 : i64} {
  func.func @_norm_linear_kresident_kernel(%arg0: i32, %arg1: i32, %arg2: memref<16x128xf32, #tpu.memory_space<vmem>>, %arg3: memref<128x128xf32, #tpu.memory_space<vmem>>, %arg4: memref<16x128xf32, #tpu.memory_space<vmem>>) attributes {dimension_semantics = [#tpu.dimension_semantics<parallel>, #tpu.dimension_semantics<parallel>], iteration_bounds = array<i64: 1, 1>, scalar_prefetch = 0 : i64, scratch_operands = 0 : i64, tpu.core_type = #tpu.core_type<tc>, window_params = [{transform_indices = @transform_0, window_bounds = array<i64: 16, 128>}, {transform_indices = @transform_1, window_bounds = array<i64: 128, 128>}, {transform_indices = @transform_2, window_bounds = array<i64: 16, 128>}]} {
    %c0 = arith.constant 0 : index
    %c0_0 = arith.constant 0 : index
    %0 = vector.load %arg3[%c0, %c0_0] : memref<128x128xf32, #tpu.memory_space<vmem>>, vector<128x128xf32>
    %1 = arith.mulf %0, %0 : vector<128x128xf32>
    %cst = arith.constant dense<0.000000e+00> : vector<128xf32>
    %2 = vector.multi_reduction <add>, %1, %cst [0] : vector<128x128xf32> to vector<128xf32>
    %3 = vector.shape_cast %2 : vector<128xf32> to vector<1x128xf32>
    %cst_1 = arith.constant 1.000000e-24 : f32
    %4 = vector.broadcast %cst_1 : f32 to vector<1x128xf32>
    %5 = arith.maximumf %3, %4 : vector<1x128xf32>
    %6 = math.rsqrt %5 : vector<1x128xf32>
    %c0_2 = arith.constant 0 : index
    %c0_3 = arith.constant 0 : index
    %7 = vector.load %arg2[%c0_2, %c0_3] : memref<16x128xf32, #tpu.memory_space<vmem>>, vector<16x128xf32>
    %cst_4 = arith.constant dense<0.000000e+00> : vector<16x128xf32>
    %8 = tpu.matmul %7, %0, %cst_4 {dimension_numbers = #tpu.dot_dimension_numbers<[1], [0], [0], [1], [0, 0, 1, 1], [], []>} : vector<16x128xf32>, vector<128x128xf32>, vector<16x128xf32> -> vector<16x128xf32>
    %9 = vector.broadcast %6 : vector<1x128xf32> to vector<16x128xf32>
    %10 = arith.mulf %8, %9 : vector<16x128xf32>
    %c0_5 = arith.constant 0 : index
    %c0_6 = arith.constant 0 : index
    %11 = vector.load %arg4[%c0_5, %c0_6] : memref<16x128xf32, #tpu.memory_space<vmem>>, vector<16x128xf32>
    tpu.vector_store %arg4[%c0_5, %c0_6], %10 {strides = array<i32>} : memref<16x128xf32, #tpu.memory_space<vmem>>, vector<16x128xf32>,
    return
  }
  func.func @transform_0(%arg0: i32, %arg1: i32) -> (i32, i32) {
    %c0_i32 = arith.constant 0 : i32
    %c0_i32_0 = arith.constant 0 : i32
    return %arg0, %c0_i32 : i32, i32
  }
  func.func @transform_1(%arg0: i32, %arg1: i32) -> (i32, i32) {
    %c0_i32 = arith.constant 0 : i32
    %c0_i32_0 = arith.constant 0 : i32
    return %c0_i32, %arg1 : i32, i32
  }
  func.func @transform_2(%arg0: i32, %arg1: i32) -> (i32, i32) {
    %c0_i32 = arith.constant 0 : i32
    return %arg0, %arg1 : i32, i32
  }
}

</mosaic_0001>

<bundles_post_ra>
// kernel: tpu_custom_call.1
= control target key start
LH: loop header
LB: loop body
LE: loop exit
PB: predicated region body
PF: predicated region fallthrough
CT: control target
= control target key end

     0   :  { %7 = vsyncpa [#allocation3], 0  ;;  %s423_s0 = inlined_call_operand.hbm [shape: f32[16,128], index: 0, kind: input, shape index: {}]   ;;  %s424_s1 = inlined_call_operand.hbm [shape: f32[128,128], index: 1, kind: input, shape index: {}]   ;;  %s425_s2 = inlined_call_operand.hbm [shape: f32[16,128], index: 2, kind: output, shape index: {}]  }
   0x1   :  { %8 = vsyncpa [#allocation6], 0 }
   0x2   :  { %9 = vsyncpa [#allocation4], 0  ;;  %s358_s9 = smov [#allocation2]   ;;  %s286_s13 = scalar_lea.hbm %s423_s0, 256 }
   0x3   :  { %s15_s10 = sshll.u32 %s358_s9, 4  ;;  %p287_p0 = scmp.ne.s32.totalorder %s423_s0, %s286_s13  ;;  %s16_s10 = int_to_ptr.vmem [resolvable:$true] %s15_s10 }
   0x4   :  { %p290_p1 = scmp.lt.u32.totalorder %s286_s13, %s423_s0 }
   0x6   :  { %p292_p2 = pnand %p290_p1, %p287_p0 }
   0x8   :  { %295 = shalt.err (!%p292_p2)
}
   0x9   :  { %s296_s18 = scalar_lea.vmem %s16_s10, 256  ;;  %p301_p4 = scmp.lt.s32.totalorder %s16_s10, %s16_s10 }
   0xa   :  { %p297_p3 = scmp.ne.s32.totalorder %s16_s10, %s296_s18  ;;  %p302_p5 = scmp.lt.s32.totalorder %s296_s18, %s296_s18 }
   0xc   :  { %p303_p6 = por %p302_p5, %p301_p4 }
   0xe   :  { %p304_p7 = pnand %p303_p6, %p297_p3 }
  0x10   :  { %307 = shalt.err (!%p304_p7)
}
  0x11   :  { %s359_s19 = smov 128   ;;  %s360_s20 = smov 8  }
  0x12   :  { %21 = dma.hbm_to_vmem [thread:$0]  %s423_s0, 256, %s16_s10, [#allocation3], %s359_s19, %s359_s19, %s360_s20  }
  0x13   :  { %s361_s23 = smov [#allocation5]   ;;  %s308_s27 = scalar_lea.hbm %s424_s1, 2048 }
  0x14   :  { %s27_s24 = sshll.u32 %s361_s23, 4  ;;  %p309_p8 = scmp.ne.s32.totalorder %s424_s1, %s308_s27  ;;  %s28_s24 = int_to_ptr.vmem [resolvable:$true] %s27_s24 }
  0x15   :  { %p312_p9 = scmp.lt.u32.totalorder %s308_s27, %s424_s1 }
  0x17   :  { %p314_p10 = pnand %p312_p9, %p309_p8 }
  0x19   :  { %317 = shalt.err (!%p314_p10)
}
  0x1a   :  { %s318_s4 = scalar_lea.vmem %s28_s24, 2048  ;;  %p323_p12 = scmp.lt.s32.totalorder %s28_s24, %s28_s24 }
  0x1b   :  { %p319_p11 = scmp.ne.s32.totalorder %s28_s24, %s318_s4  ;;  %p324_p13 = scmp.lt.s32.totalorder %s318_s4, %s318_s4 }
  0x1d   :  { %p325_p0 = por %p324_p13, %p323_p12 }
  0x1f   :  { %p326_p1 = pnand %p325_p0, %p319_p11 }
  0x21   :  { %329 = shalt.err (!%p326_p1)
}
  0x22   :  { %33 = dma.hbm_to_vmem [thread:$0]  %s424_s1, 2048, %s28_s24, [#allocation6], %s359_s19, %s359_s19, %s360_s20  }
  0x23   :  { %352 = dma.done.wait [#allocation3], 256  }
  0x24   :  { %353 = vsyncadd [#allocation3], 4294967040 }
  0x25   :  { %354 = dma.done.wait [#allocation6], 2048  }
  0x26   :  { %355 = vsyncadd [#allocation6], 4294965248  ;;  %v40_v0 = vld [vmem:[#allocation5] sm:$0xff]  ;;  %v41_v1 = vld [vmem:[#allocation5 + $0x8] sm:$0xff]  ;;  %s362_s1 = smov [#allocation7]  }
  0x27   :  { %v42_v2 = vld [vmem:[#allocation5 + $0x10] sm:$0xff]  ;;  %v56_v3 = vmul.f32 %v40_v0, %v40_v0  ;;  %v57_v4 = vmul.f32 %v41_v1, %v41_v1  ;;  %v247_v5 = vpack.c.bf16 %v41_v1, %v40_v0  ;;  %v43_v6 = vld [vmem:[#allocation5 + $0x18] sm:$0xff]  ;;  %v44_v9 = vld [vmem:[#allocation5 + $0x20] sm:$0xff]  ;;  %s181_s6 = sshll.u32 %s362_s1, 4  ;;  %s182_s6 = int_to_ptr.vmem [resolvable:$true] %s181_s6 }
  0x28   :  { %v58_v7 = vmul.f32 %v42_v2, %v42_v2  ;;  %v251_v8 = vpack.c.bf16 %v43_v6, %v42_v2  ;;  %v45_v10 = vld [vmem:[#allocation5 + $0x28] sm:$0xff]  ;;  %v59_v12 = vmul.f32 %v43_v6, %v43_v6  ;;  %v60_v14 = vmul.f32 %v44_v9, %v44_v9  ;;  %v95_v16 = vld [vmem:[#allocation2] sm:$0xff]  ;;  %v47_v18 = vld [vmem:[#allocation5 + $0x38] sm:$0xff]  ;;  %s330_s7 = scalar_lea.vmem %s182_s6, 256  ;;  %p335_p3 = scmp.lt.s32.totalorder %s182_s6, %s182_s6 }
  0x29   :  { %v72_v11 = vadd.f32 %v57_v4, %v56_v3  ;;  %248 = vmatprep.subr.bf16.mxu0 %v247_v5  ;;  %v255_v15 = vpack.c.bf16 %v45_v10, %v44_v9  ;;  %v46_v17 = vld [vmem:[#allocation5 + $0x30] sm:$0xff]  ;;  %244 = vmatprep.mubr.f32.mxu0 %v95_v16  ;;  %v61_v20 = vmul.f32 %v45_v10, %v45_v10  ;;  %v48_v24 = vld [vmem:[#allocation5 + $0x40] sm:$0xff]  ;;  %v49_v25 = vld [vmem:[#allocation5 + $0x48] sm:$0xff]  ;;  %p331_p2 = scmp.ne.s32.totalorder %s182_s6, %s330_s7  ;;  %p336_p4 = scmp.lt.s32.totalorder %s330_s7, %s330_s7 }
  0x2a   :  { %250 = vmatpush3.bf16.msra.mxu0 %v247_v5  ;;  %v62_v22 = vmul.f32 %v46_v17, %v46_v17  ;;  %v259_v23 = vpack.c.bf16 %v47_v18, %v46_v17  ;;  %v63_v27 = vmul.f32 %v47_v18, %v47_v18  ;;  %v64_v29 = vmul.f32 %v48_v24, %v48_v24  ;;  %v50_v31 = vld [vmem:[#allocation5 + $0x50] sm:$0xff]  ;;  %v51_v32 = vld [vmem:[#allocation5 + $0x58] sm:$0xff]  ;;  %v52_v38 = vld [vmem:[#allocation5 + $0x60] sm:$0xff] }
  0x2b   :  { %v73_v13 = vadd.f32 %v72_v11, %v58_v7  ;;  %252 = vmatprep.subr.bf16.mxu0 %v251_v8  ;;  %v263_v30 = vpack.c.bf16 %v49_v25, %v48_v24  ;;  %v65_v34 = vmul.f32 %v49_v25, %v49_v25  ;;  %v66_v36 = vmul.f32 %v50_v31, %v50_v31  ;;  %v53_v39 = vld [vmem:[#allocation5 + $0x68] sm:$0xff]  ;;  %v54_v45 = vld [vmem:[#allocation5 + $0x70] sm:$0xff]  ;;  %v55_v46 = vld [vmem:[#allocation5 + $0x78] sm:$0xff]  ;;  %p337_p5 = por %p336_p4, %p335_p3 }
  0x2c   :  { %v267_v37 = vpack.c.bf16 %v51_v32, %v50_v31  ;;  %v67_v41 = vmul.f32 %v51_v32, %v51_v32  ;;  %v68_v43 = vmul.f32 %v52_v38, %v52_v38  ;;  %v271_v44 = vpack.c.bf16 %v53_v39, %v52_v38  ;;  %v96_v56 = vld [vmem:[#allocation2 + $0x8] sm:$0xff] }
  0x2d   :  { %v74_v19 = vadd.f32 %v73_v13, %v59_v12  ;;  %v69_v48 = vmul.f32 %v53_v39, %v53_v39  ;;  %v70_v50 = vmul.f32 %v54_v45, %v54_v45  ;;  %v275_v51 = vpack.c.bf16 %v55_v46, %v54_v45  ;;  %p338_p6 = pnand %p337_p5, %p331_p2 }
  0x2e   :  { %254 = vmatpush3.bf16.msra.mxu0 %v251_v8  ;;  %v71_v53 = vmul.f32 %v55_v46, %v55_v46 }
  0x2f   :  { %v75_v21 = vadd.f32 %v74_v19, %v60_v14  ;;  %256 = vmatprep.subr.bf16.mxu0 %v255_v15 }
  0x31   :  { %v76_v26 = vadd.f32 %v75_v21, %v61_v20 }
  0x32   :  { %258 = vmatpush3.bf16.msra.mxu0 %v255_v15 }
  0x33   :  { %v77_v28 = vadd.f32 %v76_v26, %v62_v22  ;;  %260 = vmatprep.subr.bf16.mxu0 %v259_v23 }
  0x35   :  { %v78_v33 = vadd.f32 %v77_v28, %v63_v27 }
  0x36   :  { %262 = vmatpush3.bf16.msra.mxu0 %v259_v23 }
  0x37   :  { %v79_v35 = vadd.f32 %v78_v33, %v64_v29  ;;  %264 = vmatprep.subr.bf16.mxu0 %v263_v30 }
  0x39   :  { %v80_v40 = vadd.f32 %v79_v35, %v65_v34 }
  0x3a   :  { %266 = vmatpush3.bf16.msra.mxu0 %v263_v30 }
  0x3b   :  { %v81_v42 = vadd.f32 %v80_v40, %v66_v36  ;;  %268 = vmatprep.subr.bf16.mxu0 %v267_v37 }
  0x3d   :  { %v82_v47 = vadd.f32 %v81_v42, %v67_v41 }
  0x3e   :  { %270 = vmatpush3.bf16.msra.mxu0 %v267_v37 }
  0x3f   :  { %v83_v49 = vadd.f32 %v82_v47, %v68_v43  ;;  %272 = vmatprep.subr.bf16.mxu0 %v271_v44 }
  0x41   :  { %v84_v52 = vadd.f32 %v83_v49, %v69_v48 }
  0x42   :  { %274 = vmatpush3.bf16.msra.mxu0 %v271_v44 }
  0x43   :  { %v85_v54 = vadd.f32 %v84_v52, %v70_v50  ;;  %276 = vmatprep.subr.bf16.mxu0 %v275_v51 }
  0x45   :  { %v86_v55 = vadd.f32 %v85_v54, %v71_v53 }
  0x46   :  { %278 = vmatpush3.bf16.msra.mxu0 %v275_v51 }
  0x47   :  { %v87_v57 = vrot.slane %v86_v55, 4 }
  0x49   :  { %245 = vmatmul.mubr.f32.vlgmr.msra.gmra.mrb[0].mxu0 %v96_v56  ;;  %v88_v58 = vadd.f32 %v87_v57, %v86_v55 }
  0x4b   :  { %v89_v59 = vrot.slane %v88_v58, 2 }
  0x4d   :  { %v90_v60 = vadd.f32 %v89_v59, %v88_v58 }
  0x4f   :  { %v91_v61 = vrot.slane %v90_v60, 1 }
  0x51   :  { %v92_v62 = vadd.f32 %v91_v61, %v90_v60 }
  0x53   :  { %v93_v63 = vmax.f32 %v92_v62, 1e-24 }
  0x55   :  { %284 = vrsqrt.f32 %v93_v63 }
  0x5f   :  { %v285_v0 = vpop.eup %284 }
 0x11c   :  { %v246_v1 = vpop.f32.mrb[0].mxu0 }
 0x11d   :  { %v173_v2 = vmul.f32 %v285_v0, %v246_v1  ;;  %v163_v3 = vpop.f32.mrb[1].mxu0 }
 0x11e   :  { %v172_v4 = vmul.f32 %v285_v0, %v163_v3 }
 0x11f   :  { %175 = vst [vmem:[#allocation7 + $0x8] sm:$0xff] %v173_v2 }
 0x120   :  { %174 = vst [vmem:[#allocation7] sm:$0xff] %v172_v4 }
 0x121   :  { %341 = shalt.err (!%p338_p6)
}
 0x122   :  { %s342_s10 = scalar_lea.hbm %s425_s2, 256 }
 0x123   :  { %p343_p7 = scmp.ne.s32.totalorder %s425_s2, %s342_s10  ;;  %p346_p8 = scmp.lt.u32.totalorder %s342_s10, %s425_s2 }
 0x125   :  { %p348_p9 = pnand %p346_p8, %p343_p7 }
 0x127   :  { %351 = shalt.err (!%p348_p9)
}
 0x128   :  { %187 = dma.vmem_to_hbm [thread:$0]  %s182_s6, 256, %s425_s2, [#allocation4], %s359_s19, %s359_s19, %s360_s20  }
 0x129   :  { %356 = dma.done.wait [#allocation4], 256  }
 0x12a   :  { %357 = vsyncadd [#allocation4], 4294967040 }
 0x12b   :  { %191 = vsyncpa [#allocation3], 1 }
 0x12c   :  { %192 = vsyncpa [#allocation6], 1 }
 0x12d   :  { %193 = vsyncpa [#allocation4], 1 }

</bundles_post_ra>
